<compile_context>
chip_gen: v7x
topology: tpu7x:2x2x1
jax: 0.10.0
libtpu: 0.0.40
codegen_flags: <defaults>
</compile_context>

<pallas_src>
import functools
import math

import jax
import jax.numpy as jnp
from jax.experimental import pallas as pl
from jax.experimental.pallas import tpu as pltpu


def encoder_layer_kernel(n_heads, b, l, eps,
                         x_ref, bias_ref, rope_ref, wqkv_ref, wo_ref,
                         w1_ref, w2_ref, vec_ref, b1_ref, o_ref):
    x = x_ref[...]                                   # (T, d) f32, T = b*l
    T, d = x.shape
    dh = d // n_heads
    half = dh // 2
    dp = wqkv_ref.shape[1]                           # padded 3d (multiple of 128)
    x_bf = x.astype(jnp.bfloat16)

    # --- 1. fused QKV projection: one MXU matmul --------------------------
    qkv = jnp.dot(x_bf, wqkv_ref[...], preferred_element_type=jnp.float32)   # (T, dp)

    # --- 2. RoPE via lane rolls (XLU); linear bias folded into rope_ref[3] -
    cos_t = rope_ref[0]          # (T, dp)
    sin_a = rope_ref[1]          # multiplies roll(x, -half)  == x[j + half] (sign folded)
    sin_b = rope_ref[2]          # multiplies roll(x, +half)  == x[j - half]
    roped = (qkv * cos_t
             + pltpu.roll(qkv, dp - half, axis=1) * sin_a
             + pltpu.roll(qkv, half, axis=1) * sin_b
             + rope_ref[3])                                                   # (T, dp)

    # --- 3. head split: q/k/v each (n*b, l, dh), head-major leading dim ---
    # lane blocks of `roped` are [q_h0..q_h{n-1}, k_h0.., v_h0..]; concat on the
    # leading axis + leading-only reshape keeps the (8,128) layout untouched.
    qkvh = jnp.concatenate(
        [roped[:, j * dh:(j + 1) * dh] for j in range(3 * n_heads)], axis=0)  # (3nT, dh)
    qkvh = qkvh.reshape(3, n_heads * b, l, dh).astype(jnp.bfloat16)
    qh, kh, vh = qkvh[0], qkvh[1], qkvh[2]                                    # (n*b, l, dh)

    # --- 4. batched scores + single softmax chain over all heads ----------
    s = jnp.einsum('bqe,bke->bqk', qh, kh,
                   preferred_element_type=jnp.float32)                        # (n*b, l, l)
    s = s.reshape(n_heads, b, l, l) + bias_ref[...]   # additive mask, bcast over heads
    s = s - jnp.max(s, axis=-1, keepdims=True)
    p = jnp.exp(s)
    p = p * pl.reciprocal(jnp.sum(p, axis=-1, keepdims=True), approx=True)
    p = p.reshape(n_heads * b, l, l).astype(jnp.bfloat16)

    ctx_h = jnp.einsum('bqk,bke->bqe', p, vh,
                       preferred_element_type=jnp.float32)                    # (n*b, l, dh)

    # --- 5. regroup heads into lanes, single output projection ------------
    ctx = jnp.concatenate([ctx_h[h * b:(h + 1) * b] for h in range(n_heads)],
                          axis=-1)                                            # (b, l, d)
    ctx2d = ctx.reshape(T, d).astype(jnp.bfloat16)
    attn = jnp.dot(ctx2d, wo_ref[...],
                   preferred_element_type=jnp.float32) + vec_ref[0:1, :]      # + bo
    # dropout is identity at inference

    # --- 6. post-norm -> FFN -> post-norm ----------------------------------
    gamma = vec_ref[1:2, :]
    beta = vec_ref[2:3, :]

    def layer_norm(t):                   # f32 statistics
        mu = jnp.mean(t, axis=-1, keepdims=True)
        var = jnp.mean((t - mu) ** 2, axis=-1, keepdims=True)
        return gamma * (t - mu) * jax.lax.rsqrt(var + eps) + beta

    x2 = layer_norm(attn + x)

    hdn = jnp.dot(x2.astype(jnp.bfloat16), w1_ref[...],
                  preferred_element_type=jnp.float32) + b1_ref[...]
    hdn = jnp.maximum(hdn, 0.0)
    f2 = jnp.dot(hdn.astype(jnp.bfloat16), w2_ref[...],
                 preferred_element_type=jnp.float32) + vec_ref[3:4, :]        # + b2

    o_ref[...] = layer_norm(f2 + x2).astype(o_ref.dtype)


def encoder_layer(x, mask, params, n_heads, eps=1e-6):
    b, l, d = x.shape
    dh = d // n_heads
    half = dh // 2
    T = b * l
    d_ff = params["w1"].shape[1]
    scale = 1.0 / math.sqrt(dh)
    dp = ((3 * d + 127) // 128) * 128                 # QKV output padded to full lanes

    # --- wrapper-side precompute (plain JAX glue) ---------------------------
    # Fused / padded QKV weight; 1/sqrt(dh) folded into Wq, bq.
    wqkv = jnp.concatenate([params["wq"] * scale, params["wk"], params["wv"]], axis=1)
    wqkv = jnp.pad(wqkv, ((0, 0), (0, dp - 3 * d))).astype(jnp.bfloat16)      # (d, dp)
    bqkv = jnp.concatenate([params["bq"] * scale, params["bk"], params["bv"]], axis=1)
    bqkv = jnp.pad(bqkv, ((0, 0), (0, dp - 3 * d)))                           # (1, dp) f32

    # Rotary tables (non-interleaved rotate-half convention, as before).
    inv_freq = 1.0 / (10000.0 ** (jnp.arange(0, dh, 2, dtype=jnp.float32) / dh))
    ang = jnp.arange(l, dtype=jnp.float32)[:, None] * inv_freq[None, :]       # (l, dh/2)
    cos_h = jnp.concatenate([jnp.cos(ang), jnp.cos(ang)], axis=1)             # (l, dh)
    sin_h = jnp.concatenate([jnp.sin(ang), jnp.sin(ang)], axis=1)             # (l, dh)
    lo = (jnp.arange(dh) < half).astype(jnp.float32)
    sin_a_h = -sin_h * lo                  # multiplies x[j + half]  (p <  half)
    sin_b_h = sin_h * (1.0 - lo)           # multiplies x[j - half]  (p >= half)

    def full_table(head_tbl, v_fill):
        qk = jnp.tile(head_tbl, (1, 2 * n_heads))                            # q,k lanes
        vv = jnp.full((l, d), v_fill, jnp.float32)                           # v lanes
        pad = jnp.zeros((l, dp - 3 * d), jnp.float32)
        return jnp.tile(jnp.concatenate([qk, vv, pad], axis=1), (b, 1))      # (T, dp)

    cos_t = full_table(cos_h, 1.0)
    sin_a = full_table(sin_a_h, 0.0)
    sin_b = full_table(sin_b_h, 0.0)
    # rope(xW + b) = rope(xW) + [b*cos + roll(b,+half)*sinB + roll(b,-half)*sinA]
    bias_term = (bqkv * cos_t
                 + jnp.roll(bqkv, half, axis=1) * sin_b
                 + jnp.roll(bqkv, -half, axis=1) * sin_a)                     # (T, dp)
    rope_tbl = jnp.stack([cos_t, sin_a, sin_b, bias_term], axis=0)            # (4, T, dp)

    # Additive attention-mask bias, kept f32 (v5e VPU has no bf16 path).
    bias = jnp.where(mask != 0, 0.0, -1e9).astype(jnp.float32)                # (b, l, l)

    # Packed small vectors: rows = [bo, gamma, beta, b2].
    vecs = jnp.concatenate([params["bo"], params["gamma"],
                            params["beta"], params["b2"]], axis=0)            # (4, d)

    wo = params["wo"].astype(jnp.bfloat16)
    w1 = params["w1"].astype(jnp.bfloat16)
    w2 = params["w2"].astype(jnp.bfloat16)

    # Whole (tiny) batch in one kernel step: flatten (b, l, d) -> (T, d).
    x2d = x.reshape(T, d)

    kernel = functools.partial(encoder_layer_kernel, n_heads, b, l, eps)
    n_inputs = 9
    out2d = pl.pallas_call(
        kernel,
        out_shape=jax.ShapeDtypeStruct((T, d), x.dtype),
        in_specs=[pl.BlockSpec(memory_space=pltpu.MemorySpace.VMEM)
                  for _ in range(n_inputs)],
        out_specs=pl.BlockSpec(memory_space=pltpu.MemorySpace.VMEM),
    )(x2d, bias, rope_tbl, wqkv, wo, w1, w2, vecs, params["b1"])

    return out2d.reshape(b, l, d)


if __name__ == "__main__":
    # Small shapes consistent with the module: (b, l, d) = (2, 8, 32),
    # n=4 heads (head dim 8), d_ff=64, max_len >= l.
    b, l, d, n, d_ff = 2, 8, 32, 4, 64
    key = jax.random.PRNGKey(0)
    ks = jax.random.split(key, 12)
    s = 0.05  # deterministic small-scale init

    params = {
        "wq": s * jax.random.normal(ks[0], (d, d), jnp.float32),
        "bq": jnp.zeros((1, d), jnp.float32),
        "wk": s * jax.random.normal(ks[1], (d, d), jnp.float32),
        "bk": jnp.zeros((1, d), jnp.float32),
        "wv": s * jax.random.normal(ks[2], (d, d), jnp.float32),
        "bv": jnp.zeros((1, d), jnp.float32),
        "wo": s * jax.random.normal(ks[3], (d, d), jnp.float32),
        "bo": jnp.zeros((1, d), jnp.float32),
        "gamma": jnp.ones((1, d), jnp.float32),
        "beta": jnp.zeros((1, d), jnp.float32),
        "w1": s * jax.random.normal(ks[4], (d, d_ff), jnp.float32),
        "b1": jnp.zeros((1, d_ff), jnp.float32),
        "w2": s * jax.random.normal(ks[5], (d_ff, d), jnp.float32),
        "b2": jnp.zeros((1, d), jnp.float32),
    }

    x = jax.random.normal(ks[6], (b, l, d), jnp.float32)
    # Padding-style attention mask: keep everything, but mask out the last
    # two key positions in batch element 1 (nonzero = attend).
    mask = jnp.ones((b, l, l), jnp.float32)
    mask = mask.at[1, :, l - 2:].set(0.0)

    out = encoder_layer(x, mask, params, n_heads=n)
    jax.block_until_ready(out)
    assert out.shape == (b, l, d)
    assert bool(jnp.all(jnp.isfinite(out)))
    print("KERNEL_OK")
</pallas_src>

<mosaic_0001>
module attributes {stable_mosaic.version = 11 : i64} {
  func.func @encoder_layer_kernel(%arg0: memref<16x32xf32, #tpu.memory_space<vmem>>, %arg1: memref<2x8x8xf32, #tpu.memory_space<vmem>>, %arg2: memref<4x16x128xf32, #tpu.memory_space<vmem>>, %arg3: memref<32x128xbf16, #tpu.memory_space<vmem>>, %arg4: memref<32x32xbf16, #tpu.memory_space<vmem>>, %arg5: memref<32x64xbf16, #tpu.memory_space<vmem>>, %arg6: memref<64x32xbf16, #tpu.memory_space<vmem>>, %arg7: memref<4x32xf32, #tpu.memory_space<vmem>>, %arg8: memref<1x64xf32, #tpu.memory_space<vmem>>, %arg9: memref<16x32xf32, #tpu.memory_space<vmem>>) attributes {dimension_semantics = [], scalar_prefetch = 0 : i64, scratch_operands = 0 : i64, tpu.core_type = #tpu.core_type<tc>} {
    %c0 = arith.constant 0 : index
    %c0_0 = arith.constant 0 : index
    %0 = vector.load %arg0[%c0, %c0_0] : memref<16x32xf32, #tpu.memory_space<vmem>>, vector<16x32xf32>
    %1 = arith.truncf %0 : vector<16x32xf32> to vector<16x32xbf16>
    %c0_1 = arith.constant 0 : index
    %c0_2 = arith.constant 0 : index
    %2 = vector.load %arg3[%c0_1, %c0_2] : memref<32x128xbf16, #tpu.memory_space<vmem>>, vector<32x128xbf16>
    %cst = arith.constant dense<0.000000e+00> : vector<16x128xf32>
    %3 = tpu.matmul %1, %2, %cst {dimension_numbers = #tpu.dot_dimension_numbers<[1], [0], [0], [1], [0, 0, 1, 1], [], []>} : vector<16x32xbf16>, vector<32x128xbf16>, vector<16x128xf32> -> vector<16x128xf32>
    %c0_3 = arith.constant 0 : index
    %c0_4 = arith.constant 0 : index
    %c0_5 = arith.constant 0 : index
    %4 = vector.load %arg2[%c0_3, %c0_4, %c0_5] : memref<4x16x128xf32, #tpu.memory_space<vmem>>, vector<1x16x128xf32>
    %5 = vector.shape_cast %4 : vector<1x16x128xf32> to vector<16x128xf32>
    %c1 = arith.constant 1 : index
    %c0_6 = arith.constant 0 : index
    %c0_7 = arith.constant 0 : index
    %6 = vector.load %arg2[%c1, %c0_6, %c0_7] : memref<4x16x128xf32, #tpu.memory_space<vmem>>, vector<1x16x128xf32>
    %7 = vector.shape_cast %6 : vector<1x16x128xf32> to vector<16x128xf32>
    %c2 = arith.constant 2 : index
    %c0_8 = arith.constant 0 : index
    %c0_9 = arith.constant 0 : index
    %8 = vector.load %arg2[%c2, %c0_8, %c0_9] : memref<4x16x128xf32, #tpu.memory_space<vmem>>, vector<1x16x128xf32>
    %9 = vector.shape_cast %8 : vector<1x16x128xf32> to vector<16x128xf32>
    %10 = arith.mulf %3, %5 : vector<16x128xf32>
    %c124_i32 = arith.constant 124 : i32
    %11 = tpu.dynamic_rotate %3 by %c124_i32 dim 1 : vector<16x128xf32>, i32 -> vector<16x128xf32>
    %12 = arith.mulf %11, %7 : vector<16x128xf32>
    %13 = arith.addf %10, %12 : vector<16x128xf32>
    %c4_i32 = arith.constant 4 : i32
    %14 = tpu.dynamic_rotate %3 by %c4_i32 dim 1 : vector<16x128xf32>, i32 -> vector<16x128xf32>
    %15 = arith.mulf %14, %9 : vector<16x128xf32>
    %16 = arith.addf %13, %15 : vector<16x128xf32>
    %c3 = arith.constant 3 : index
    %c0_10 = arith.constant 0 : index
    %c0_11 = arith.constant 0 : index
    %17 = vector.load %arg2[%c3, %c0_10, %c0_11] : memref<4x16x128xf32, #tpu.memory_space<vmem>>, vector<1x16x128xf32>
    %18 = vector.shape_cast %17 : vector<1x16x128xf32> to vector<16x128xf32>
    %19 = arith.addf %16, %18 : vector<16x128xf32>
    %20 = vector.extract_strided_slice %19 {offsets = [0, 0], sizes = [16, 8], strides = [1, 1]} : vector<16x128xf32> to vector<16x8xf32>
    %21 = vector.extract_strided_slice %19 {offsets = [0, 8], sizes = [16, 8], strides = [1, 1]} : vector<16x128xf32> to vector<16x8xf32>
    %22 = vector.extract_strided_slice %19 {offsets = [0, 16], sizes = [16, 8], strides = [1, 1]} : vector<16x128xf32> to vector<16x8xf32>
    %23 = vector.extract_strided_slice %19 {offsets = [0, 24], sizes = [16, 8], strides = [1, 1]} : vector<16x128xf32> to vector<16x8xf32>
    %24 = vector.extract_strided_slice %19 {offsets = [0, 32], sizes = [16, 8], strides = [1, 1]} : vector<16x128xf32> to vector<16x8xf32>
    %25 = vector.extract_strided_slice %19 {offsets = [0, 40], sizes = [16, 8], strides = [1, 1]} : vector<16x128xf32> to vector<16x8xf32>
    %26 = vector.extract_strided_slice %19 {offsets = [0, 48], sizes = [16, 8], strides = [1, 1]} : vector<16x128xf32> to vector<16x8xf32>
    %27 = vector.extract_strided_slice %19 {offsets = [0, 56], sizes = [16, 8], strides = [1, 1]} : vector<16x128xf32> to vector<16x8xf32>
    %28 = vector.extract_strided_slice %19 {offsets = [0, 64], sizes = [16, 8], strides = [1, 1]} : vector<16x128xf32> to vector<16x8xf32>
    %29 = vector.extract_strided_slice %19 {offsets = [0, 72], sizes = [16, 8], strides = [1, 1]} : vector<16x128xf32> to vector<16x8xf32>
    %30 = vector.extract_strided_slice %19 {offsets = [0, 80], sizes = [16, 8], strides = [1, 1]} : vector<16x128xf32> to vector<16x8xf32>
    %31 = vector.extract_strided_slice %19 {offsets = [0, 88], sizes = [16, 8], strides = [1, 1]} : vector<16x128xf32> to vector<16x8xf32>
    %32 = tpu.concatenate %20, %21, %22, %23, %24, %25, %26, %27, %28, %29, %30, %31 in 0 : vector<16x8xf32>, vector<16x8xf32>, vector<16x8xf32>, vector<16x8xf32>, vector<16x8xf32>, vector<16x8xf32>, vector<16x8xf32>, vector<16x8xf32>, vector<16x8xf32>, vector<16x8xf32>, vector<16x8xf32>, vector<16x8xf32> -> vector<192x8xf32>
    %33 = vector.shape_cast %32 : vector<192x8xf32> to vector<3x8x8x8xf32>
    %34 = arith.truncf %33 : vector<3x8x8x8xf32> to vector<3x8x8x8xbf16>
    %35 = vector.extract_strided_slice %34 {offsets = [0, 0, 0, 0], sizes = [1, 8, 8, 8], strides = [1, 1, 1, 1]} : vector<3x8x8x8xbf16> to vector<1x8x8x8xbf16>
    %36 = vector.shape_cast %35 : vector<1x8x8x8xbf16> to vector<8x8x8xbf16>
    %37 = vector.extract_strided_slice %34 {offsets = [1, 0, 0, 0], sizes = [1, 8, 8, 8], strides = [1, 1, 1, 1]} : vector<3x8x8x8xbf16> to vector<1x8x8x8xbf16>
    %38 = vector.shape_cast %37 : vector<1x8x8x8xbf16> to vector<8x8x8xbf16>
    %39 = vector.extract_strided_slice %34 {offsets = [2, 0, 0, 0], sizes = [1, 8, 8, 8], strides = [1, 1, 1, 1]} : vector<3x8x8x8xbf16> to vector<1x8x8x8xbf16>
    %40 = vector.shape_cast %39 : vector<1x8x8x8xbf16> to vector<8x8x8xbf16>
    "tpu.trace_start"() <{level = 10 : i32, message = "bqe,bke->bqk"}> : () -> ()
    %cst_12 = arith.constant dense<0.000000e+00> : vector<8x8x8xf32>
    %41 = tpu.matmul %36, %38, %cst_12 {dimension_numbers = #tpu.dot_dimension_numbers<[2], [2], [1], [1], [0, 0, 0, 1, 1, 1], [0], [0]>} : vector<8x8x8xbf16>, vector<8x8x8xbf16>, vector<8x8x8xf32> -> vector<8x8x8xf32>
    "tpu.trace_stop"() : () -> ()
    %42 = vector.shape_cast %41 : vector<8x8x8xf32> to vector<4x2x8x8xf32>
    %c0_13 = arith.constant 0 : index
    %c0_14 = arith.constant 0 : index
    %c0_15 = arith.constant 0 : index
    %43 = vector.load %arg1[%c0_13, %c0_14, %c0_15] : memref<2x8x8xf32, #tpu.memory_space<vmem>>, vector<2x8x8xf32>
    %44 = vector.shape_cast %43 : vector<2x8x8xf32> to vector<1x2x8x8xf32>
    %45 = vector.broadcast %44 : vector<1x2x8x8xf32> to vector<4x2x8x8xf32>
    %46 = arith.addf %42, %45 : vector<4x2x8x8xf32>
    %cst_16 = arith.constant dense<0xFF800000> : vector<4x2x8xf32>
    %47 = vector.multi_reduction <maximumf>, %46, %cst_16 [3] : vector<4x2x8x8xf32> to vector<4x2x8xf32>
    %48 = vector.shape_cast %47 : vector<4x2x8xf32> to vector<4x2x8x1xf32>
    %49 = vector.broadcast %48 : vector<4x2x8x1xf32> to vector<4x2x8x8xf32>
    %50 = arith.subf %46, %49 : vector<4x2x8x8xf32>
    %51 = math.exp %50 : vector<4x2x8x8xf32>
    %cst_17 = arith.constant dense<0.000000e+00> : vector<4x2x8xf32>
    %52 = vector.multi_reduction <add>, %51, %cst_17 [3] : vector<4x2x8x8xf32> to vector<4x2x8xf32>
    %53 = vector.shape_cast %52 : vector<4x2x8xf32> to vector<4x2x8x1xf32>
    %54 = tpu.reciprocal %53 {approx = true} : vector<4x2x8x1xf32> -> vector<4x2x8x1xf32>
    %55 = vector.broadcast %54 : vector<4x2x8x1xf32> to vector<4x2x8x8xf32>
    %56 = arith.mulf %51, %55 : vector<4x2x8x8xf32>
    %57 = vector.shape_cast %56 : vector<4x2x8x8xf32> to vector<8x8x8xf32>
    %58 = arith.truncf %57 : vector<8x8x8xf32> to vector<8x8x8xbf16>
    "tpu.trace_start"() <{level = 10 : i32, message = "bqk,bke->bqe"}> : () -> ()
    %cst_18 = arith.constant dense<0.000000e+00> : vector<8x8x8xf32>
    %59 = tpu.matmul %58, %40, %cst_18 {dimension_numbers = #tpu.dot_dimension_numbers<[2], [1], [1], [2], [0, 0, 0, 1, 1, 2], [0], [0]>} : vector<8x8x8xbf16>, vector<8x8x8xbf16>, vector<8x8x8xf32> -> vector<8x8x8xf32>
    "tpu.trace_stop"() : () -> ()
    %60 = vector.extract_strided_slice %59 {offsets = [0, 0, 0], sizes = [2, 8, 8], strides = [1, 1, 1]} : vector<8x8x8xf32> to vector<2x8x8xf32>
    %61 = vector.extract_strided_slice %59 {offsets = [2, 0, 0], sizes = [2, 8, 8], strides = [1, 1, 1]} : vector<8x8x8xf32> to vector<2x8x8xf32>
    %62 = vector.extract_strided_slice %59 {offsets = [4, 0, 0], sizes = [2, 8, 8], strides = [1, 1, 1]} : vector<8x8x8xf32> to vector<2x8x8xf32>
    %63 = vector.extract_strided_slice %59 {offsets = [6, 0, 0], sizes = [2, 8, 8], strides = [1, 1, 1]} : vector<8x8x8xf32> to vector<2x8x8xf32>
    %64 = tpu.concatenate %60, %61, %62, %63 in 2 : vector<2x8x8xf32>, vector<2x8x8xf32>, vector<2x8x8xf32>, vector<2x8x8xf32> -> vector<2x8x32xf32>
    %65 = vector.shape_cast %64 : vector<2x8x32xf32> to vector<16x32xf32>
    %66 = arith.truncf %65 : vector<16x32xf32> to vector<16x32xbf16>
    %c0_19 = arith.constant 0 : index
    %c0_20 = arith.constant 0 : index
    %67 = vector.load %arg4[%c0_19, %c0_20] : memref<32x32xbf16, #tpu.memory_space<vmem>>, vector<32x32xbf16>
    %cst_21 = arith.constant dense<0.000000e+00> : vector<16x32xf32>
    %68 = tpu.matmul %66, %67, %cst_21 {dimension_numbers = #tpu.dot_dimension_numbers<[1], [0], [0], [1], [0, 0, 1, 1], [], []>} : vector<16x32xbf16>, vector<32x32xbf16>, vector<16x32xf32> -> vector<16x32xf32>
    %c0_22 = arith.constant 0 : index
    %c0_23 = arith.constant 0 : index
    %69 = vector.load %arg7[%c0_22, %c0_23] : memref<4x32xf32, #tpu.memory_space<vmem>>, vector<1x32xf32>
    %70 = vector.broadcast %69 : vector<1x32xf32> to vector<16x32xf32>
    %71 = arith.addf %68, %70 : vector<16x32xf32>
    %c1_24 = arith.constant 1 : index
    %c0_25 = arith.constant 0 : index
    %72 = vector.load %arg7[%c1_24, %c0_25] : memref<4x32xf32, #tpu.memory_space<vmem>>, vector<1x32xf32>
    %c2_26 = arith.constant 2 : index
    %c0_27 = arith.constant 0 : index
    %73 = vector.load %arg7[%c2_26, %c0_27] : memref<4x32xf32, #tpu.memory_space<vmem>>, vector<1x32xf32>
    %74 = arith.addf %71, %0 : vector<16x32xf32>
    %cst_28 = arith.constant dense<0.000000e+00> : vector<16xf32>
    %75 = vector.multi_reduction <add>, %74, %cst_28 [1] : vector<16x32xf32> to vector<16xf32>
    %76 = vector.shape_cast %75 : vector<16xf32> to vector<16x1xf32>
    %cst_29 = arith.constant 3.200000e+01 : f32
    %77 = vector.broadcast %cst_29 : f32 to vector<16x1xf32>
    %78 = arith.divf %76, %77 : vector<16x1xf32>
    %79 = vector.broadcast %78 : vector<16x1xf32> to vector<16x32xf32>
    %80 = arith.subf %74, %79 : vector<16x32xf32>
    %81 = arith.mulf %80, %80 : vector<16x32xf32>
    %cst_30 = arith.constant dense<0.000000e+00> : vector<16xf32>
    %82 = vector.multi_reduction <add>, %81, %cst_30 [1] : vector<16x32xf32> to vector<16xf32>
    %83 = vector.shape_cast %82 : vector<16xf32> to vector<16x1xf32>
    %cst_31 = arith.constant 3.200000e+01 : f32
    %84 = vector.broadcast %cst_31 : f32 to vector<16x1xf32>
    %85 = arith.divf %83, %84 : vector<16x1xf32>
    %86 = vector.broadcast %78 : vector<16x1xf32> to vector<16x32xf32>
    %87 = arith.subf %74, %86 : vector<16x32xf32>
    %88 = vector.broadcast %72 : vector<1x32xf32> to vector<16x32xf32>
    %89 = arith.mulf %88, %87 : vector<16x32xf32>
    %cst_32 = arith.constant 9.99999997E-7 : f32
    %90 = vector.broadcast %cst_32 : f32 to vector<16x1xf32>
    %91 = arith.addf %85, %90 : vector<16x1xf32>
    %92 = math.rsqrt %91 : vector<16x1xf32>
    %93 = vector.broadcast %92 : vector<16x1xf32> to vector<16x32xf32>
    %94 = arith.mulf %89, %93 : vector<16x32xf32>
    %95 = vector.broadcast %73 : vector<1x32xf32> to vector<16x32xf32>
    %96 = arith.addf %94, %95 : vector<16x32xf32>
    %97 = arith.truncf %96 : vector<16x32xf32> to vector<16x32xbf16>
    %c0_33 = arith.constant 0 : index
    %c0_34 = arith.constant 0 : index
    %98 = vector.load %arg5[%c0_33, %c0_34] : memref<32x64xbf16, #tpu.memory_space<vmem>>, vector<32x64xbf16>
    %cst_35 = arith.constant dense<0.000000e+00> : vector<16x64xf32>
    %99 = tpu.matmul %97, %98, %cst_35 {dimension_numbers = #tpu.dot_dimension_numbers<[1], [0], [0], [1], [0, 0, 1, 1], [], []>} : vector<16x32xbf16>, vector<32x64xbf16>, vector<16x64xf32> -> vector<16x64xf32>
    %c0_36 = arith.constant 0 : index
    %c0_37 = arith.constant 0 : index
    %100 = vector.load %arg8[%c0_36, %c0_37] : memref<1x64xf32, #tpu.memory_space<vmem>>, vector<1x64xf32>
    %101 = vector.broadcast %100 : vector<1x64xf32> to vector<16x64xf32>
    %102 = arith.addf %99, %101 : vector<16x64xf32>
    %cst_38 = arith.constant 0.000000e+00 : f32
    %103 = vector.broadcast %cst_38 : f32 to vector<16x64xf32>
    %104 = arith.maximumf %102, %103 : vector<16x64xf32>
    %105 = arith.truncf %104 : vector<16x64xf32> to vector<16x64xbf16>
    %c0_39 = arith.constant 0 : index
    %c0_40 = arith.constant 0 : index
    %106 = vector.load %arg6[%c0_39, %c0_40] : memref<64x32xbf16, #tpu.memory_space<vmem>>, vector<64x32xbf16>
    %cst_41 = arith.constant dense<0.000000e+00> : vector<16x32xf32>
    %107 = tpu.matmul %105, %106, %cst_41 {dimension_numbers = #tpu.dot_dimension_numbers<[1], [0], [0], [1], [0, 0, 1, 1], [], []>} : vector<16x64xbf16>, vector<64x32xbf16>, vector<16x32xf32> -> vector<16x32xf32>
    %c3_42 = arith.constant 3 : index
    %c0_43 = arith.constant 0 : index
    %108 = vector.load %arg7[%c3_42, %c0_43] : memref<4x32xf32, #tpu.memory_space<vmem>>, vector<1x32xf32>
    %109 = vector.broadcast %108 : vector<1x32xf32> to vector<16x32xf32>
    %110 = arith.addf %107, %109 : vector<16x32xf32>
    %111 = arith.addf %110, %96 : vector<16x32xf32>
    %cst_44 = arith.constant dense<0.000000e+00> : vector<16xf32>
    %112 = vector.multi_reduction <add>, %111, %cst_44 [1] : vector<16x32xf32> to vector<16xf32>
    %113 = vector.shape_cast %112 : vector<16xf32> to vector<16x1xf32>
    %cst_45 = arith.constant 3.200000e+01 : f32
    %114 = vector.broadcast %cst_45 : f32 to vector<16x1xf32>
    %115 = arith.divf %113, %114 : vector<16x1xf32>
    %116 = vector.broadcast %115 : vector<16x1xf32> to vector<16x32xf32>
    %117 = arith.subf %111, %116 : vector<16x32xf32>
    %118 = arith.mulf %117, %117 : vector<16x32xf32>
    %cst_46 = arith.constant dense<0.000000e+00> : vector<16xf32>
    %119 = vector.multi_reduction <add>, %118, %cst_46 [1] : vector<16x32xf32> to vector<16xf32>
    %120 = vector.shape_cast %119 : vector<16xf32> to vector<16x1xf32>
    %cst_47 = arith.constant 3.200000e+01 : f32
    %121 = vector.broadcast %cst_47 : f32 to vector<16x1xf32>
    %122 = arith.divf %120, %121 : vector<16x1xf32>
    %123 = vector.broadcast %115 : vector<16x1xf32> to vector<16x32xf32>
    %124 = arith.subf %111, %123 : vector<16x32xf32>
    %125 = vector.broadcast %72 : vector<1x32xf32> to vector<16x32xf32>
    %126 = arith.mulf %125, %124 : vector<16x32xf32>
    %cst_48 = arith.constant 9.99999997E-7 : f32
    %127 = vector.broadcast %cst_48 : f32 to vector<16x1xf32>
    %128 = arith.addf %122, %127 : vector<16x1xf32>
    %129 = math.rsqrt %128 : vector<16x1xf32>
    %130 = vector.broadcast %129 : vector<16x1xf32> to vector<16x32xf32>
    %131 = arith.mulf %126, %130 : vector<16x32xf32>
    %132 = vector.broadcast %73 : vector<1x32xf32> to vector<16x32xf32>
    %133 = arith.addf %131, %132 : vector<16x32xf32>
    %c0_49 = arith.constant 0 : index
    %c0_50 = arith.constant 0 : index
    %134 = vector.load %arg9[%c0_49, %c0_50] : memref<16x32xf32, #tpu.memory_space<vmem>>, vector<16x32xf32>
    tpu.vector_store %arg9[%c0_49, %c0_50], %133 {strides = array<i32>} : memref<16x32xf32, #tpu.memory_space<vmem>>, vector<16x32xf32>,
    return
  }
}

</mosaic_0001>

<bundles_post_ra>
// kernel: tpu_custom_call.1
= control target key start
LH: loop header
LB: loop body
LE: loop exit
PB: predicated region body
PF: predicated region fallthrough
CT: control target
= control target key end

     0   :  { %14 = vsyncpa [#allocation3], 0  ;;  %s2278_s0 = inlined_call_operand.vmem [shape: f32[16,32], index: 0, kind: input, shape index: {}]   ;;  %s2279_s1 = inlined_call_operand.vmem [shape: f32[2,8,8], index: 1, kind: input, shape index: {}]   ;;  %s2280_s2 = inlined_call_operand.hbm [shape: f32[4,16,128], index: 2, kind: input, shape index: {}]   ;;  %s2281_s3 = inlined_call_operand.vmem [shape: bf16[32,128], index: 3, kind: input, shape index: {}]   ;;  %s2282_s4 = inlined_call_operand.hbm [shape: bf16[32,32], index: 4, kind: input, shape index: {}]   ;;  %s2283_s5 = inlined_call_operand.hbm [shape: bf16[32,64], index: 5, kind: input, shape index: {}]   ;;  %s2284_s6 = inlined_call_operand.vmem [shape: bf16[64,32], index: 6, kind: input, shape index: {}]   ;;  %s2285_s7 = inlined_call_operand.vmem [shape: f32[4,32], index: 7, kind: input, shape index: {}]   ;;  %s2286_s8 = inlined_call_operand.vmem [shape: f32[1,64], index: 8, kind: input, shape index: {}]   ;;  %s2287_s9 = inlined_call_operand.hbm [shape: f32[16,32], index: 9, kind: output, shape index: {}]  }
   0x1   :  { %15 = vsyncpa [#allocation6], 0 }
   0x2   :  { %16 = vsyncpa [#allocation4], 0  ;;  %s1902_s30 = smov [#allocation5]   ;;  %s1808_s13 = scalar_lea.hbm %s2282_s4, 256 }
   0x3   :  { %s40_s10 = sshll.u32 %s1902_s30, 4  ;;  %p1809_p0 = scmp.ne.s32.totalorder %s2282_s4, %s1808_s13  ;;  %s41_s10 = int_to_ptr.vmem [resolvable:$true] %s40_s10 }
   0x4   :  { %p1812_p1 = scmp.lt.u32.totalorder %s1808_s13, %s2282_s4 }
   0x6   :  { %p1814_p2 = pnand %p1812_p1, %p1809_p0 }
   0x8   :  { %1817 = shalt.err (!%p1814_p2)
}
   0x9   :  { %s1818_s18 = scalar_lea.vmem %s41_s10, 256  ;;  %p1823_p4 = scmp.lt.s32.totalorder %s41_s10, %s41_s10 }
   0xa   :  { %p1819_p3 = scmp.ne.s32.totalorder %s41_s10, %s1818_s18  ;;  %p1824_p5 = scmp.lt.s32.totalorder %s1818_s18, %s1818_s18 }
   0xc   :  { %p1825_p6 = por %p1824_p5, %p1823_p4 }
   0xe   :  { %p1826_p7 = pnand %p1825_p6, %p1819_p3 }
  0x10   :  { %1829 = shalt.err (!%p1826_p7)
}
  0x11   :  { %s1903_s19 = smov 64   ;;  %s1904_s20 = smov 4  }
  0x12   :  { %46 = dma.hbm_to_vmem [thread:$0]  %s2282_s4, 256, %s41_s10, [#allocation6], %s1903_s19, %s1903_s19, %s1904_s20  }
  0x13   :  { %s1905_s23 = smov [#allocation2]   ;;  %s1830_s27 = scalar_lea.hbm %s2280_s2, 1024 }
  0x14   :  { %s26_s24 = sshll.u32 %s1905_s23, 4  ;;  %p1831_p8 = scmp.ne.s32.totalorder %s2280_s2, %s1830_s27  ;;  %s27_s24 = int_to_ptr.vmem [resolvable:$true] %s26_s24 }
  0x15   :  { %p1834_p9 = scmp.lt.u32.totalorder %s1830_s27, %s2280_s2 }
  0x17   :  { %p1836_p10 = pnand %p1834_p9, %p1831_p8 }
  0x19   :  { %1839 = shalt.err (!%p1836_p10)
}
  0x1a   :  { %s1840_s12 = scalar_lea.vmem %s27_s24, 1024  ;;  %p1845_p12 = scmp.lt.s32.totalorder %s27_s24, %s27_s24 }
  0x1b   :  { %p1841_p11 = scmp.ne.s32.totalorder %s27_s24, %s1840_s12  ;;  %p1846_p13 = scmp.lt.s32.totalorder %s1840_s12, %s1840_s12 }
  0x1d   :  { %p1847_p0 = por %p1846_p13, %p1845_p12 }
  0x1f   :  { %p1848_p1 = pnand %p1847_p0, %p1841_p11 }
  0x21   :  { %1851 = shalt.err (!%p1848_p1)
}
  0x22   :  { %s1906_s4 = smov 128   ;;  %s1907_s10 = smov 8  }
  0x23   :  { %32 = dma.hbm_to_vmem [thread:$0]  %s2280_s2, 1024, %s27_s24, [#allocation3], %s1906_s4, %s1906_s4, %s1907_s10  }
  0x24   :  { %s1908_s15 = smov [#allocation7]   ;;  %s1852_s21 = scalar_lea.hbm %s2283_s5, 256 }
  0x25   :  { %s52_s16 = sshll.u32 %s1908_s15, 4  ;;  %p1853_p2 = scmp.ne.s32.totalorder %s2283_s5, %s1852_s21  ;;  %s53_s16 = int_to_ptr.vmem [resolvable:$true] %s52_s16 }
  0x26   :  { %p1856_p3 = scmp.lt.u32.totalorder %s1852_s21, %s2283_s5 }
  0x28   :  { %p1858_p4 = pnand %p1856_p3, %p1853_p2 }
  0x2a   :  { %1861 = shalt.err (!%p1858_p4)
}
  0x2b   :  { %s1862_s27 = scalar_lea.vmem %s53_s16, 256  ;;  %p1867_p6 = scmp.lt.s32.totalorder %s53_s16, %s53_s16 }
  0x2c   :  { %p1863_p5 = scmp.ne.s32.totalorder %s53_s16, %s1862_s27  ;;  %p1868_p7 = scmp.lt.s32.totalorder %s1862_s27, %s1862_s27 }
  0x2e   :  { %p1869_p8 = por %p1868_p7, %p1867_p6 }
  0x30   :  { %p1870_p9 = pnand %p1869_p8, %p1863_p5 }
  0x32   :  { %1873 = shalt.err (!%p1870_p9)
}
  0x33   :  { %58 = dma.hbm_to_vmem [thread:$0]  %s2283_s5, 256, %s53_s16, [#allocation6], %s1903_s19, %s1903_s19, %s1904_s20  }
  0x34   :  { %1896 = dma.done.wait [#allocation3], 1024  }
  0x35   :  { %1897 = vsyncadd [#allocation3], 4294966272 }
  0x36   :  { %1898 = dma.done.wait [#allocation6], 512  }
  0x37   :  { %1899 = vsyncadd [#allocation6], 4294966784  ;;  %v1909_v0 = vmov 0.0   ;;  %vm1910_vm0 = vmmov 0   ;;  %v1758_v1 = vld [vmem:[%s2281_s3] sm:$0xff]   ;;  %v1759_v2 = vld [vmem:[%s2281_s3 + $0x8] sm:$0xff]  }
  0x38   :  { %1533 = vmatprep.subr.bf16.mxu0 %v1909_v0  ;;  %1537 = vmatprep.mubr.msk.bf16.mxu0 %vm1910_vm0, %v1909_v0  ;;  %v2035_v3 = vld [vmem:[%s2278_s0] sm:$0xff]  ;;  %v2040_v4 = vld [vmem:[%s2278_s0 + $0x8] sm:$0xff]  ;;  %vm94_vm1 = vcmask 261120   ;;  %s1911_s3 = smov 124   ;;  %v142_v11 = vld [vmem:[#allocation2 + $0x10] sm:$0xff]  ;;  %s1912_s0 = smov 88  }
  0x39   :  { %1541 = vmatprep.subr.bf16.mxu1 %v1909_v0  ;;  %1543 = vmatprep.mubr.msk.bf16.mxu1 %vm1910_vm0, %v1909_v0  ;;  %v77_v5 = vpack.c.bf16 %v2040_v4, %v2035_v3  ;;  %v139_v10 = vld [vmem:[#allocation2] sm:$0xff]  ;;  %v140_v16 = vld [vmem:[#allocation2 + $0x8] sm:$0xff]  ;;  %v143_v18 = vld [vmem:[#allocation2 + $0x18] sm:$0xff]  ;;  %s1914_s15 = smov 80   ;;  %s1915_s16 = smov 120   ;;  %vm262_vm2 = vcmask 64512  }
  0x3a   :  { %1534 = vmatpush3.bf16.msra.mxu0 %v1758_v1  ;;  %v145_v17 = vld [vmem:[#allocation2 + $0x20] sm:$0xff]  ;;  %v146_v20 = vld [vmem:[#allocation2 + $0x28] sm:$0xff]  ;;  %v166_v29 = vld [vmem:[#allocation2 + $0x30] sm:$0xff]  ;;  %s1916_s17 = smov 72   ;;  %s1917_s18 = smov 112   ;;  %vm740_vm3 = vcmask 1043456  }
  0x3b   :  { %1535 = vmatprep.subr.bf16.mxu0 %v1909_v0  ;;  %v167_v30 = vld [vmem:[#allocation2 + $0x38] sm:$0xff]  ;;  %s1918_s21 = smov 104   ;;  %s1921_s27 = smov 56   ;;  %vm1132_vm4 = vcmask 130048   ;;  %vm1135_vm5 = vcmask 195584   ;;  %vm1355_vm6 = vcmask 523264  }
  0x3c   :  { %s1922_s2 = smov 16   ;;  %s1923_s24 = smov 24  }
  0x3e   :  { %1536 = vmatpush3.bf16.msra.mxu0 %v1759_v2 }
  0x3f   :  { %1547 = vmatprep.subr.bf16.mxu0 %v1909_v0 }
  0x41   :  { %1538 = vmatmul.mubr.msk.bf16.vlgmr.msra.gmra.mrb[0].mxu0 %vm94_vm1, %v77_v5 }
  0x42   :  { %1549 = vmatprep.mubr.msk.bf16.mxu0 %vm1910_vm0, %v1909_v0 }
 0x114   :  { %v132_v6 = vpop.f32.mrb[0].mxu0 }
 0x115   :  { %157 = vrot.lane.b32.xlu1 %v132_v6, %s1904_s20  ;;  %149 = vrot.lane.b32.xlu0 %v132_v6, %s1911_s3  ;;  %v1539_v7 = vpop.f32.mrb[1].mxu0  ;;  %v147_v14 = vmul.f32 %v139_v10, %v132_v6 }
 0x116   :  { %v135_v8 = vpop.f32.mrb[2].mxu0 }
 0x117   :  { %v1540_v9 = vpop.f32.mrb[3].mxu0  ;;  %v148_v23 = vmul.f32 %v140_v16, %v135_v8 }
 0x119   :  { %159 = vrot.lane.b32.xlu1 %v135_v8, %s1904_s20  ;;  %151 = vrot.lane.b32.xlu0 %v135_v8, %s1911_s3  ;;  %s1913_s20 = smov 96  }
 0x187   :  { %v158_v12 = vpop.permute.xlu1 %157  ;;  %v150_v13 = vpop.permute.xlu0 %149 }
 0x188   :  { %v153_v15 = vmul.f32 %v150_v13, %v142_v11  ;;  %v161_v24 = vmul.f32 %v158_v12, %v145_v17 }
 0x18a   :  { %v155_v19 = vadd.f32 %v153_v15, %v147_v14 }
 0x18b   :  { %v160_v21 = vpop.permute.xlu1 %159  ;;  %v152_v22 = vpop.permute.xlu0 %151 }
 0x18c   :  { %v154_v25 = vmul.f32 %v152_v22, %v143_v18  ;;  %v163_v26 = vadd.f32 %v161_v24, %v155_v19  ;;  %v162_v27 = vmul.f32 %v160_v21, %v146_v20  ;;  %v631_v19 = vld [vmem:[%s2279_s1] sm:$0xff]  ;;  %v632_v20 = vld [vmem:[%s2279_s1 + $0x8] sm:$0xff]  ;;  %s1919_s1 = smov 48  }
 0x18e   :  { %v156_v28 = vadd.f32 %v154_v25, %v148_v23  ;;  %v168_v32 = vadd.f32 %v166_v29, %v163_v26 }
 0x190   :  { %v164_v31 = vadd.f32 %v162_v27, %v156_v28  ;;  %v238_v48 = vpack.c.bf16 %v168_v32, %v168_v32 }
 0x192   :  { %v169_v33 = vadd.f32 %v167_v30, %v164_v31 }
 0x194   :  { %v2051_v34 = vpack.i.bf16 %v169_v33, %v168_v32  ;;  %v239_v50 = vpack.c.bf16 %v169_v33, %v169_v33 }
 0x196   :  { %1694 = vrot.lane.b32.xlu1 %v2051_v34, %s1912_s0  ;;  %1689 = vrot.lane.b32.xlu0 %v2051_v34, %s1913_s20 }
 0x19a   :  { %1704 = vrot.lane.b32.xlu1 %v2051_v34, %s1914_s15  ;;  %1699 = vrot.lane.b32.xlu0 %v2051_v34, %s1915_s16 }
 0x19e   :  { %1714 = vrot.lane.b32.xlu1 %v2051_v34, %s1916_s17  ;;  %1709 = vrot.lane.b32.xlu0 %v2051_v34, %s1917_s18 }
 0x1a2   :  { %1719 = vrot.lane.b32.xlu0 %v2051_v34, %s1918_s21 }
 0x208   :  { %v1690_v35 = vpop.permute.xlu0 %1689  ;;  %v1695_v38 = vpop.permute.xlu1 %1694 }
 0x209   :  { %v1692_v36 = vunpack.i.h.bf16 %v1690_v35  ;;  %v1691_v37 = vunpack.i.l.bf16 %v1690_v35  ;;  %v1696_v41 = vunpack.i.l.bf16 %v1695_v38  ;;  %v1697_v44 = vunpack.i.h.bf16 %v1695_v38 }
 0x20b   :  { %v247_v39 = vpack.c.bf16 %v1692_v36, %v1692_v36  ;;  %v246_v40 = vpack.c.bf16 %v1691_v37, %v1691_v37  ;;  %v248_v45 = vpack.c.bf16 %v1696_v41, %v1696_v41  ;;  %v249_v46 = vpack.c.bf16 %v1697_v44, %v1697_v44 }
 0x20c   :  { %v1705_v47 = vpop.permute.xlu1 %1704  ;;  %v1700_v49 = vpop.permute.xlu0 %1699 }
 0x20d   :  { %v267_v42 = vsel %vm262_vm2, %v246_v40, 0  ;;  %v313_v43 = vsel %vm262_vm2, %v247_v39, 0  ;;  %v1706_v51 = vunpack.i.l.bf16 %v1705_v47  ;;  %v359_v52 = vsel %vm262_vm2, %v248_v45, 0 }
 0x20e   :  { %1542 = vmatpush3.bf16.xpose.msra.mxu1 %v267_v42  ;;  %1548 = vmatpush3.bf16.xpose.msra.mxu0 %v313_v43  ;;  %v1707_v53 = vunpack.i.h.bf16 %v1705_v47  ;;  %v405_v54 = vsel %vm262_vm2, %v249_v46, 0  ;;  %v1701_v55 = vunpack.i.l.bf16 %v1700_v49  ;;  %v1702_v56 = vunpack.i.h.bf16 %v1700_v49 }
 0x20f   :  { %1553 = vmatprep.subr.bf16.mxu1 %v1909_v0  ;;  %1559 = vmatprep.subr.bf16.mxu0 %v1909_v0  ;;  %v250_v57 = vpack.c.bf16 %v1706_v51, %v1706_v51 }
 0x210   :  { %v251_v58 = vpack.c.bf16 %v1707_v53, %v1707_v53  ;;  %v1715_v59 = vpop.permute.xlu1 %1714  ;;  %v240_v60 = vpack.c.bf16 %v1701_v55, %v1701_v55  ;;  %v241_v61 = vpack.c.bf16 %v1702_v56, %v1702_v56  ;;  %v1710_v62 = vpop.permute.xlu0 %1709 }
 0x211   :  { %v1716_v63 = vunpack.i.l.bf16 %v1715_v59  ;;  %v451_v1 = vsel %vm262_vm2, %v250_v57, 0  ;;  %v1717_v2 = vunpack.i.h.bf16 %v1715_v59  ;;  %v1711_v6 = vunpack.i.l.bf16 %v1710_v62 }
 0x212   :  { %v497_v5 = vsel %vm262_vm2, %v251_v58, 0  ;;  %v1712_v7 = vunpack.i.h.bf16 %v1710_v62 }
 0x213   :  { %v252_v8 = vpack.c.bf16 %v1716_v63, %v1716_v63  ;;  %v253_v9 = vpack.c.bf16 %v1717_v2, %v1717_v2  ;;  %v242_v10 = vpack.c.bf16 %v1711_v6, %v1711_v6 }
 0x214   :  { %v243_v11 = vpack.c.bf16 %v1712_v7, %v1712_v7  ;;  %v1720_v12 = vpop.permute.xlu0 %1719 }
 0x215   :  { %1544 = vmatmul.mubr.msk.bf16.vlgmr.msra.gmra.mrb[0].mxu1 %vm262_vm2, %v238_v48  ;;  %1550 = vmatmul.mubr.msk.bf16.vlgmr.msra.gmra.mrb[4].mxu0 %vm262_vm2, %v239_v50  ;;  %v543_v13 = vsel %vm262_vm2, %v252_v8, 0  ;;  %v589_v14 = vsel %vm262_vm2, %v253_v9, 0  ;;  %v1721_v15 = vunpack.i.l.bf16 %v1720_v12  ;;  %v1722_v16 = vunpack.i.h.bf16 %v1720_v12 }
 0x216   :  { %1554 = vmatpush3.bf16.xpose.msra.mxu1 %v359_v52  ;;  %1560 = vmatpush3.bf16.xpose.msra.mxu0 %v405_v54 }
 0x217   :  { %1555 = vmatprep.mubr.msk.bf16.mxu1 %vm1910_vm0, %v1909_v0  ;;  %1561 = vmatprep.mubr.msk.bf16.mxu0 %vm1910_vm0, %v1909_v0  ;;  %v244_v17 = vpack.c.bf16 %v1721_v15, %v1721_v15  ;;  %v245_v18 = vpack.c.bf16 %v1722_v16, %v1722_v16 }
 0x218   :  { %1565 = vmatprep.subr.bf16.mxu1 %v1909_v0  ;;  %1571 = vmatprep.subr.bf16.mxu0 %v1909_v0 }
 0x21d   :  { %1556 = vmatmul.mubr.msk.bf16.vlgmr.msra.gmra.mrb[4].mxu1 %vm262_vm2, %v240_v60  ;;  %1562 = vmatmul.mubr.msk.bf16.vlgmr.msra.gmra.mrb[8].mxu0 %vm262_vm2, %v241_v61 }
 0x21e   :  { %1566 = vmatpush3.bf16.xpose.msra.mxu1 %v451_v1  ;;  %1572 = vmatpush3.bf16.xpose.msra.mxu0 %v497_v5 }
 0x21f   :  { %1567 = vmatprep.mubr.msk.bf16.mxu1 %vm1910_vm0, %v1909_v0  ;;  %1573 = vmatprep.mubr.msk.bf16.mxu0 %vm1910_vm0, %v1909_v0 }
 0x220   :  { %1577 = vmatprep.subr.bf16.mxu1 %v1909_v0  ;;  %1583 = vmatprep.subr.bf16.mxu0 %v1909_v0 }
 0x225   :  { %1568 = vmatmul.mubr.msk.bf16.vlgmr.msra.gmra.mrb[8].mxu1 %vm262_vm2, %v242_v10  ;;  %1574 = vmatmul.mubr.msk.bf16.vlgmr.msra.gmra.mrb[12].mxu0 %vm262_vm2, %v243_v11 }
 0x226   :  { %1578 = vmatpush3.bf16.xpose.msra.mxu1 %v543_v13  ;;  %1584 = vmatpush3.bf16.xpose.msra.mxu0 %v589_v14 }
 0x227   :  { %1579 = vmatprep.mubr.msk.bf16.mxu1 %vm1910_vm0, %v1909_v0  ;;  %1585 = vmatprep.mubr.msk.bf16.mxu0 %vm1910_vm0, %v1909_v0 }
 0x228   :  { %1589 = vmatprep.subr.bf16.mxu1 %v1909_v0  ;;  %1595 = vmatprep.subr.bf16.mxu0 %v1909_v0 }
 0x22d   :  { %1580 = vmatmul.mubr.msk.bf16.vlgmr.msra.gmra.mrb[12].mxu1 %vm262_vm2, %v244_v17  ;;  %1586 = vmatmul.mubr.msk.bf16.vlgmr.msra.gmra.mrb[16].mxu0 %vm262_vm2, %v245_v18 }
 0x22e   :  { %1591 = vmatprep.mubr.msk.bf16.mxu1 %vm1910_vm0, %v1909_v0  ;;  %1597 = vmatprep.mubr.msk.bf16.mxu0 %vm1910_vm0, %v1909_v0 }
 0x2e8   :  { %v303_v21 = vpop.f32.mrb[0].mxu1  ;;  %v349_v23 = vpop.f32.mrb[4].mxu0 }
 0x2e9   :  { %v633_v22 = vadd.f32 %v631_v19, %v303_v21  ;;  %v1545_v24 = vpop.f32.mrb[1].mxu1  ;;  %v634_v25 = vadd.f32 %v632_v20, %v349_v23  ;;  %v1551_v26 = vpop.f32.mrb[5].mxu0 }
 0x2ea   :  { %v306_v27 = vpop.f32.mrb[2].mxu1  ;;  %v352_v28 = vpop.f32.mrb[6].mxu0 }
 0x2eb   :  { %v1546_v29 = vpop.f32.mrb[3].mxu1  ;;  %v641_v30 = vsel %vm262_vm2, %v633_v22, -inf  ;;  %v1552_v31 = vpop.f32.mrb[7].mxu0  ;;  %v644_v32 = vsel %vm262_vm2, %v634_v25, -inf }
 0x2ec   :  { %642 = vmax.xlane.f32.xlu1 %v641_v30  ;;  %645 = vmax.xlane.f32.xlu0 %v644_v32 }
 0x2f0   :  { %v395_v33 = vpop.f32.mrb[4].mxu1  ;;  %v441_v36 = vpop.f32.mrb[8].mxu0 }
 0x2f1   :  { %v635_v35 = vadd.f32 %v631_v19, %v395_v33  ;;  %v1557_v37 = vpop.f32.mrb[5].mxu1  ;;  %v636_v38 = vadd.f32 %v632_v20, %v441_v36  ;;  %v1563_v39 = vpop.f32.mrb[9].mxu0 }
 0x2f2   :  { %v398_v40 = vpop.f32.mrb[6].mxu1  ;;  %v444_v41 = vpop.f32.mrb[10].mxu0 }
 0x2f3   :  { %v1558_v42 = vpop.f32.mrb[7].mxu1  ;;  %v647_v43 = vsel %vm262_vm2, %v635_v35, -inf  ;;  %v1564_v44 = vpop.f32.mrb[11].mxu0  ;;  %v650_v45 = vsel %vm262_vm2, %v636_v38, -inf }
 0x2f4   :  { %648 = vmax.xlane.f32.xlu0 %v647_v43  ;;  %651 = vmax.xlane.f32.xlu1 %v650_v45 }
 0x2f8   :  { %v487_v46 = vpop.f32.mrb[8].mxu1  ;;  %v533_v48 = vpop.f32.mrb[12].mxu0 }
 0x2f9   :  { %v637_v47 = vadd.f32 %v631_v19, %v487_v46  ;;  %v1569_v49 = vpop.f32.mrb[9].mxu1  ;;  %v638_v50 = vadd.f32 %v632_v20, %v533_v48  ;;  %v1575_v51 = vpop.f32.mrb[13].mxu0 }
 0x2fa   :  { %v490_v52 = vpop.f32.mrb[10].mxu1  ;;  %v536_v53 = vpop.f32.mrb[14].mxu0 }
 0x2fb   :  { %v1570_v54 = vpop.f32.mrb[11].mxu1  ;;  %v653_v55 = vsel %vm262_vm2, %v637_v47, -inf  ;;  %v1576_v56 = vpop.f32.mrb[15].mxu0  ;;  %v656_v57 = vsel %vm262_vm2, %v638_v50, -inf }
 0x2fc   :  { %654 = vmax.xlane.f32.xlu0 %v653_v55  ;;  %657 = vmax.xlane.f32.xlu1 %v656_v57 }
 0x300   :  { %v579_v58 = vpop.f32.mrb[12].mxu1  ;;  %v625_v60 = vpop.f32.mrb[16].mxu0 }
 0x301   :  { %v639_v59 = vadd.f32 %v631_v19, %v579_v58  ;;  %v1581_v61 = vpop.f32.mrb[13].mxu1  ;;  %v640_v62 = vadd.f32 %v632_v20, %v625_v60  ;;  %v1587_v63 = vpop.f32.mrb[17].mxu0 }
 0x302   :  { %v582_v1 = vpop.f32.mrb[14].mxu1  ;;  %v628_v2 = vpop.f32.mrb[18].mxu0 }
 0x303   :  { %v1582_v5 = vpop.f32.mrb[15].mxu1  ;;  %v659_v6 = vsel %vm262_vm2, %v639_v59, -inf  ;;  %v1588_v7 = vpop.f32.mrb[19].mxu0  ;;  %v662_v8 = vsel %vm262_vm2, %v640_v62, -inf }
 0x304   :  { %660 = vmax.xlane.f32.xlu0 %v659_v6  ;;  %663 = vmax.xlane.f32.xlu1 %v662_v8 }
 0x31a   :  { %1724 = vrot.lane.b32.xlu0 %v2051_v34, %s1903_s19  ;;  %s1920_s19 = smov 40  }
 0x379   :  { %v643_v9 = vpop.xlane.xlu1 %642  ;;  %v646_v11 = vpop.xlane.xlu0 %645 }
 0x37a   :  { %v665_v10 = vsub.f32 %v633_v22, %v643_v9  ;;  %v666_v12 = vsub.f32 %v634_v25, %v646_v11 }
 0x37c   :  { %v673_v13 = vmul.f32 1.442695, %v665_v10  ;;  %v675_v14 = vmul.f32 1.442695, %v666_v12 }
 0x37e   :  { %1768 = vpow2.f32 %v673_v13 }
 0x37f   :  { %1770 = vpow2.f32 %v675_v14 }
 0x381   :  { %v649_v15 = vpop.xlane.xlu0 %648  ;;  %v652_v17 = vpop.xlane.xlu1 %651 }
 0x382   :  { %v667_v16 = vsub.f32 %v635_v35, %v649_v15  ;;  %v668_v18 = vsub.f32 %v636_v38, %v652_v17 }
 0x384   :  { %v677_v19 = vmul.f32 1.442695, %v667_v16  ;;  %v679_v20 = vmul.f32 1.442695, %v668_v18 }
 0x386   :  { %1772 = vpow2.f32 %v677_v19 }
 0x387   :  { %1774 = vpow2.f32 %v679_v20 }
 0x388   :  { %v2116_v21 = vpop.eup %1768 }
 0x389   :  { %v2118_v23 = vpop.eup %1770  ;;  %v655_v24 = vpop.xlane.xlu0 %654  ;;  %v689_v22 = vsel %vm262_vm2, %v2116_v21, 0.0 }
 0x38a   :  { %v669_v25 = vsub.f32 %v637_v47, %v655_v24  ;;  %v658_v26 = vpop.xlane.xlu1 %657  ;;  %690 = vadd.xlane.f32.xlu0 %v689_v22  ;;  %v692_v27 = vsel %vm262_vm2, %v2118_v23, 0.0 }
 0x38b   :  { %v670_v28 = vsub.f32 %v638_v50, %v658_v26  ;;  %693 = vadd.xlane.f32.xlu1 %v692_v27 }
 0x38c   :  { %v681_v29 = vmul.f32 1.442695, %v669_v25 }
 0x38d   :  { %v683_v30 = vmul.f32 1.442695, %v670_v28 }
 0x38e   :  { %1776 = vpow2.f32 %v681_v29 }
 0x38f   :  { %1778 = vpow2.f32 %v683_v30 }
 0x390   :  { %v2124_v31 = vpop.eup %1772 }
 0x391   :  { %v2126_v32 = vpop.eup %1774  ;;  %v661_v33 = vpop.xlane.xlu0 %660  ;;  %v695_v35 = vsel %vm262_vm2, %v2124_v31, 0.0 }
 0x392   :  { %v671_v36 = vsub.f32 %v639_v59, %v661_v33  ;;  %v664_v37 = vpop.xlane.xlu1 %663  ;;  %696 = vadd.xlane.f32.xlu0 %v695_v35  ;;  %v698_v38 = vsel %vm262_vm2, %v2126_v32, 0.0 }
 0x393   :  { %v672_v39 = vsub.f32 %v640_v62, %v664_v37  ;;  %699 = vadd.xlane.f32.xlu1 %v698_v38 }
 0x394   :  { %v685_v40 = vmul.f32 1.442695, %v671_v36 }
 0x395   :  { %v687_v41 = vmul.f32 1.442695, %v672_v39  ;;  %v1725_v42 = vpop.permute.xlu0 %1724 }
 0x396   :  { %1780 = vpow2.f32 %v685_v40  ;;  %v1727_v43 = vunpack.i.h.bf16 %v1725_v42  ;;  %v1726_v44 = vunpack.i.l.bf16 %v1725_v42 }
 0x397   :  { %1782 = vpow2.f32 %v687_v41 }
 0x398   :  { %v2132_v45 = vpop.eup %1776  ;;  %v255_v46 = vpack.c.bf16 %v1727_v43, %v1727_v43  ;;  %v254_v47 = vpack.c.bf16 %v1726_v44, %v1726_v44 }
 0x399   :  { %v2134_v48 = vpop.eup %1778  ;;  %v701_v49 = vsel %vm262_vm2, %v2132_v45, 0.0 }
 0x39a   :  { %702 = vadd.xlane.f32.xlu0 %v701_v49  ;;  %v704_v50 = vsel %vm262_vm2, %v2134_v48, 0.0  ;;  %v742_v51 = vsel %vm740_vm3, %v254_v47, 0  ;;  %v788_v52 = vsel %vm740_vm3, %v255_v46, 0 }
 0x39b   :  { %705 = vadd.xlane.f32.xlu1 %v704_v50  ;;  %1590 = vmatpush3.bf16.msra.mxu1 %v742_v51 }
 0x39c   :  { %1596 = vmatpush3.bf16.msra.mxu0 %v788_v52  ;;  %1601 = vmatprep.subr.bf16.mxu1 %v1909_v0 }
 0x39d   :  { %1607 = vmatprep.subr.bf16.mxu0 %v1909_v0 }
 0x3a0   :  { %v2144_v53 = vpop.eup %1780 }
 0x3a1   :  { %v707_v54 = vsel %vm262_vm2, %v2144_v53, 0.0  ;;  %v2148_v55 = vpop.eup %1782 }
 0x3a2   :  { %708 = vadd.xlane.f32.xlu1 %v707_v54  ;;  %v710_v56 = vsel %vm262_vm2, %v2148_v55, 0.0 }
 0x3a6   :  { %711 = vadd.xlane.f32.xlu1 %v710_v56 }
 0x3b0   :  { %1734 = vrot.lane.b32.xlu0 %v2051_v34, %s1919_s1 }
 0x3b4   :  { %1739 = vrot.lane.b32.xlu0 %v2051_v34, %s1920_s19 }
 0x3b7   :  { %1729 = vrot.lane.b32.xlu1 %v2051_v34, %s1921_s27 }
 0x417   :  { %v691_v57 = vpop.xlane.xlu0 %690 }
 0x418   :  { %1784 = vrcp.f32 %v691_v57  ;;  %v694_v58 = vpop.xlane.xlu1 %693 }
 0x419   :  { %1786 = vrcp.f32 %v694_v58 }
 0x41f   :  { %v697_v34 = vpop.xlane.xlu0 %696 }
 0x420   :  { %v700_v2 = vpop.xlane.xlu1 %699  ;;  %1788 = vrcp.f32 %v697_v34 }
 0x421   :  { %1790 = vrcp.f32 %v700_v2 }
 0x422   :  { %v1785_v59 = vpop.eup %1784 }
 0x423   :  { %v1787_v60 = vpop.eup %1786  ;;  %v721_v61 = vmul.f32 %v1785_v59, %v2116_v21  ;;  %v1760_v59 = vld [vmem:[#allocation5] sm:$0xff]  }
 0x424   :  { %v722_v62 = vmul.f32 %v1787_v60, %v2118_v23 }
 0x425   :  { %v729_v63 = vpack.c.bf16 %v721_v61, %v721_v61 }
 0x426   :  { %v730_v1 = vpack.c.bf16 %v722_v62, %v722_v62 }
 0x427   :  { %1592 = vmatmul.mubr.msk.bf16.vlgmr.msra.gmra.mrb[16].mxu1 %vm262_vm2, %v729_v63  ;;  %v703_v6 = vpop.xlane.xlu0 %702 }
 0x428   :  { %1598 = vmatmul.mubr.msk.bf16.vlgmr.msra.gmra.mrb[20].mxu0 %vm262_vm2, %v730_v1  ;;  %1603 = vmatprep.mubr.msk.bf16.mxu1 %vm1910_vm0, %v1909_v0  ;;  %v706_v5 = vpop.xlane.xlu1 %705  ;;  %1792 = vrcp.f32 %v703_v6 }
 0x429   :  { %1609 = vmatprep.mubr.msk.bf16.mxu0 %vm1910_vm0, %v1909_v0  ;;  %1794 = vrcp.f32 %v706_v5 }
 0x42a   :  { %v1789_v10 = vpop.eup %1788 }
 0x42b   :  { %v1735_v9 = vpop.permute.xlu0 %1734  ;;  %v1791_v11 = vpop.eup %1790  ;;  %v723_v17 = vmul.f32 %v1789_v10, %v2124_v31 }
 0x42c   :  { %v1737_v12 = vunpack.i.h.bf16 %v1735_v9  ;;  %v1736_v14 = vunpack.i.l.bf16 %v1735_v9  ;;  %v724_v18 = vmul.f32 %v1791_v11, %v2126_v32 }
 0x42d   :  { %v731_v27 = vpack.c.bf16 %v723_v17, %v723_v17 }
 0x42e   :  { %v259_v21 = vpack.c.bf16 %v1737_v12, %v1737_v12  ;;  %v258_v23 = vpack.c.bf16 %v1736_v14, %v1736_v14  ;;  %v732_v28 = vpack.c.bf16 %v724_v18, %v724_v18 }
 0x42f   :  { %v709_v7 = vpop.xlane.xlu1 %708  ;;  %v1740_v25 = vpop.permute.xlu0 %1739 }
 0x430   :  { %1796 = vrcp.f32 %v709_v7  ;;  %v1742_v30 = vunpack.i.h.bf16 %v1740_v25  ;;  %v1741_v31 = vunpack.i.l.bf16 %v1740_v25  ;;  %v926_v32 = vsel %vm740_vm3, %v258_v23, 0  ;;  %v1761_v7 = vld [vmem:[#allocation5 + $0x8] sm:$0xff]  }
 0x431   :  { %v972_v33 = vsel %vm740_vm3, %v259_v21, 0 }
 0x432   :  { %v1793_v26 = vpop.eup %1792  ;;  %v261_v37 = vpack.c.bf16 %v1742_v30, %v1742_v30  ;;  %v260_v38 = vpack.c.bf16 %v1741_v31, %v1741_v31 }
 0x433   :  { %v712_v8 = vpop.xlane.xlu1 %711  ;;  %v1795_v29 = vpop.eup %1794  ;;  %v725_v35 = vmul.f32 %v1793_v26, %v2132_v45 }
 0x434   :  { %1798 = vrcp.f32 %v712_v8  ;;  %v726_v36 = vmul.f32 %v1795_v29, %v2134_v48  ;;  %v1018_v43 = vsel %vm740_vm3, %v260_v38, 0  ;;  %v1064_v44 = vsel %vm740_vm3, %v261_v37, 0 }
 0x435   :  { %v733_v40 = vpack.c.bf16 %v725_v35, %v725_v35 }
 0x436   :  { %v734_v41 = vpack.c.bf16 %v726_v36, %v726_v36 }
 0x437   :  { %v1730_v13 = vpop.permute.xlu1 %1729 }
 0x438   :  { %v1732_v15 = vunpack.i.h.bf16 %v1730_v13  ;;  %v1731_v16 = vunpack.i.l.bf16 %v1730_v13 }
 0x43a   :  { %v257_v19 = vpack.c.bf16 %v1732_v15, %v1732_v15  ;;  %v256_v20 = vpack.c.bf16 %v1731_v16, %v1731_v16  ;;  %v1797_v39 = vpop.eup %1796 }
 0x43b   :  { %v727_v45 = vmul.f32 %v1797_v39, %v2144_v53 }
 0x43c   :  { %v834_v24 = vsel %vm740_vm3, %v256_v20, 0  ;;  %v880_v22 = vsel %vm740_vm3, %v257_v19, 0 }
 0x43d   :  { %1602 = vmatpush3.bf16.msra.mxu1 %v834_v24  ;;  %1608 = vmatpush3.bf16.msra.mxu0 %v880_v22  ;;  %v735_v47 = vpack.c.bf16 %v727_v45, %v727_v45 }
 0x43e   :  { %1613 = vmatprep.subr.bf16.mxu1 %v1909_v0  ;;  %1619 = vmatprep.subr.bf16.mxu0 %v1909_v0  ;;  %v1799_v42 = vpop.eup %1798 }
 0x43f   :  { %v728_v46 = vmul.f32 %v1799_v42, %v2148_v55 }
 0x440   :  { %1604 = vmatmul.mubr.msk.bf16.vlgmr.msra.gmra.mrb[20].mxu1 %vm262_vm2, %v731_v27  ;;  %1610 = vmatmul.mubr.msk.bf16.vlgmr.msra.gmra.mrb[24].mxu0 %vm262_vm2, %v732_v28 }
 0x441   :  { %1614 = vmatpush3.bf16.msra.mxu1 %v926_v32  ;;  %1620 = vmatpush3.bf16.msra.mxu0 %v972_v33  ;;  %v736_v48 = vpack.c.bf16 %v728_v46, %v728_v46 }
 0x442   :  { %1615 = vmatprep.mubr.msk.bf16.mxu1 %vm1910_vm0, %v1909_v0  ;;  %1621 = vmatprep.mubr.msk.bf16.mxu0 %vm1910_vm0, %v1909_v0 }
 0x443   :  { %1625 = vmatprep.subr.bf16.mxu1 %v1909_v0  ;;  %1631 = vmatprep.subr.bf16.mxu0 %v1909_v0 }
 0x448   :  { %1616 = vmatmul.mubr.msk.bf16.vlgmr.msra.gmra.mrb[24].mxu1 %vm262_vm2, %v733_v40  ;;  %1622 = vmatmul.mubr.msk.bf16.vlgmr.msra.gmra.mrb[28].mxu0 %vm262_vm2, %v734_v41  ;;  %v1471_v41 = vld [vmem:[%s2285_s7] ss:$0 sm:$0xff] }
 0x449   :  { %1626 = vmatpush3.bf16.msra.mxu1 %v1018_v43  ;;  %1632 = vmatpush3.bf16.msra.mxu0 %v1064_v44 }
 0x44a   :  { %1627 = vmatprep.mubr.msk.bf16.mxu1 %vm1910_vm0, %v1909_v0  ;;  %1633 = vmatprep.mubr.msk.bf16.mxu0 %vm1910_vm0, %v1909_v0 }
 0x44b   :  { %1637 = vmatprep.subr.bf16.mxu1 %v1909_v0  ;;  %1645 = vmatprep.subr.bf16.mxu0 %v1909_v0 }
 0x450   :  { %1628 = vmatmul.mubr.msk.bf16.vlgmr.msra.gmra.mrb[28].mxu1 %vm262_vm2, %v735_v47  ;;  %1634 = vmatmul.mubr.msk.bf16.vlgmr.msra.gmra.mrb[32].mxu0 %vm262_vm2, %v736_v48 }
 0x451   :  { %1641 = vmatprep.mubr.msk.bf16.mxu1 %vm1910_vm0, %v1909_v0  ;;  %1649 = vmatprep.mubr.msk.bf16.mxu0 %vm1910_vm0, %v1909_v0 }
 0x452   :  { %1638 = vmatpush3.bf16.msra.mxu1 %v1760_v59 }
 0x453   :  { %1639 = vmatprep.subr.bf16.mxu1 %v1909_v0 }
 0x456   :  { %1640 = vmatpush3.bf16.msra.mxu1 %v1761_v7 }
 0x457   :  { %1653 = vmatprep.subr.bf16.mxu1 %v1909_v0 }
 0x4fa   :  { %v778_v49 = vpop.f32.mrb[16].mxu1 }
 0x4fb   :  { %v824_v50 = vpop.f32.mrb[20].mxu0  ;;  %v1593_v51 = vpop.f32.mrb[17].mxu1 }
 0x4fc   :  { %v1599_v52 = vpop.f32.mrb[21].mxu0  ;;  %v781_v53 = vpop.f32.mrb[18].mxu1 }
 0x4fd   :  { %v827_v54 = vpop.f32.mrb[22].mxu0  ;;  %v1594_v55 = vpop.f32.mrb[19].mxu1 }
 0x4fe   :  { %v1600_v56 = vpop.f32.mrb[23].mxu0 }
 0x513   :  { %v870_v57 = vpop.f32.mrb[20].mxu1  ;;  %v916_v58 = vpop.f32.mrb[24].mxu0 }
 0x514   :  { %v1743_v60 = vpack.i.bf16 %v916_v58, %v870_v57  ;;  %v1605_v61 = vpop.f32.mrb[21].mxu1  ;;  %v1611_v62 = vpop.f32.mrb[25].mxu0 }
 0x515   :  { %v873_v63 = vpop.f32.mrb[22].mxu1  ;;  %v919_v1 = vpop.f32.mrb[26].mxu0  ;;  %v1762_v61 = vld [vmem:[#allocation7] sm:$0xff]   ;;  %v1764_v62 = vld [vmem:[%s2284_s6] sm:$0xff]  }
 0x516   :  { %v1606_v2 = vpop.f32.mrb[23].mxu1  ;;  %1744 = vrot.lane.b32.xlu1 %v1743_v60, %s1907_s10  ;;  %v1612_v34 = vpop.f32.mrb[27].mxu0  ;;  %1646 = vmatpush3.bf16.msra.mxu0 %v1762_v61  ;;  %v1765_v63 = vld [vmem:[%s2284_s6 + $0x8] sm:$0xff]  }
 0x517   :  { %1647 = vmatprep.subr.bf16.mxu0 %v1909_v0 }
 0x51b   :  { %v962_v5 = vpop.f32.mrb[24].mxu1  ;;  %v1008_v6 = vpop.f32.mrb[28].mxu0 }
 0x51c   :  { %v1748_v8 = vpack.i.bf16 %v1008_v6, %v962_v5  ;;  %v1617_v9 = vpop.f32.mrb[25].mxu1  ;;  %v1623_v10 = vpop.f32.mrb[29].mxu0 }
 0x51d   :  { %v965_v11 = vpop.f32.mrb[26].mxu1  ;;  %v1011_v12 = vpop.f32.mrb[30].mxu0 }
 0x51e   :  { %v1618_v13 = vpop.f32.mrb[27].mxu1  ;;  %1749 = vrot.lane.b32.xlu0 %v1748_v8, %s1922_s2  ;;  %v1624_v14 = vpop.f32.mrb[31].mxu0  ;;  %v2228_v8 = vld [vmem:[%s2285_s7 + $0x1] ss:$0 sm:$0xff] }
 0x51f   :  { %v2235_v14 = vld [vmem:[%s2285_s7 + $0x2] ss:$0 sm:$0xff] }
 0x523   :  { %v1054_v15 = vpop.f32.mrb[28].mxu1  ;;  %v1100_v16 = vpop.f32.mrb[32].mxu0 }
 0x524   :  { %v1753_v17 = vpack.i.bf16 %v1100_v16, %v1054_v15  ;;  %v1629_v18 = vpop.f32.mrb[29].mxu1  ;;  %v1635_v19 = vpop.f32.mrb[33].mxu0 }
 0x525   :  { %v1057_v20 = vpop.f32.mrb[30].mxu1  ;;  %v1103_v21 = vpop.f32.mrb[34].mxu0  ;;  %v1766_v19 = vld [vmem:[%s2284_s6 + $0x10] sm:$0xff]  }
 0x526   :  { %v1630_v23 = vpop.f32.mrb[31].mxu1  ;;  %1754 = vrot.lane.b32.xlu1 %v1753_v17, %s1923_s24  ;;  %v1636_v24 = vpop.f32.mrb[35].mxu0  ;;  %v1767_v20 = vld [vmem:[%s2284_s6 + $0x18] sm:$0xff]   ;;  %v1477_v21 = vld [vmem:[%s2286_s8] ss:$0 sm:$0xff]  ;;  %s1924_s6 = smov [#allocation8]  }
 0x588   :  { %v1745_v22 = vpop.permute.xlu1 %1744 }
 0x589   :  { %v1747_v26 = vunpack.i.h.bf16 %v1745_v22  ;;  %v1746_v27 = vunpack.i.l.bf16 %v1745_v22 }
 0x58b   :  { %v1131_v31 = vsel %vm262_vm2, %v824_v50, %v1747_v26  ;;  %v1130_v32 = vsel %vm262_vm2, %v778_v49, %v1746_v27 }
 0x590   :  { %v1750_v25 = vpop.permute.xlu0 %1749 }
 0x591   :  { %v1752_v28 = vunpack.i.h.bf16 %v1750_v25  ;;  %v1751_v29 = vunpack.i.l.bf16 %v1750_v25 }
 0x593   :  { %v1134_v36 = vsel %vm1132_vm4, %v1131_v31, %v1752_v28  ;;  %v1133_v37 = vsel %vm1132_vm4, %v1130_v32, %v1751_v29 }
 0x598   :  { %v1755_v30 = vpop.permute.xlu1 %1754 }
 0x599   :  { %v1757_v33 = vunpack.i.h.bf16 %v1755_v30  ;;  %v1756_v35 = vunpack.i.l.bf16 %v1755_v30 }
 0x59b   :  { %v1137_v38 = vsel %vm1135_vm5, %v1134_v36, %v1757_v33  ;;  %v1136_v39 = vsel %vm1135_vm5, %v1133_v37, %v1756_v35 }
 0x59c   :  { %v1138_v40 = vpack.c.bf16 %v1137_v38, %v1136_v39 }
 0x59e   :  { %1642 = vmatmul.mubr.msk.bf16.vlgmr.msra.gmra.mrb[32].mxu1 %vm94_vm1, %v1138_v40 }
 0x59f   :  { %1661 = vmatprep.mubr.msk.bf16.mxu1 %vm1910_vm0, %v1909_v0  ;;  %1654 = vmatpush3.bf16.msra.mxu1 %v1764_v62 }
 0x5a0   :  { %1655 = vmatprep.subr.bf16.mxu1 %v1909_v0 }
 0x5a3   :  { %1656 = vmatpush3.bf16.msra.mxu1 %v1765_v63 }
 0x5a4   :  { %1657 = vmatprep.subr.bf16.mxu1 %v1909_v0 }
 0x5a7   :  { %1658 = vmatpush3.bf16.msra.mxu1 %v1766_v19 }
 0x5a8   :  { %1659 = vmatprep.subr.bf16.mxu1 %v1909_v0  ;;  %v1481_v0 = vld [vmem:[%s2285_s7 + $0x3] ss:$0 sm:$0xff]  ;;  %s1439_s7 = sshll.u32 %s1924_s6, 4  ;;  %s1440_s7 = int_to_ptr.vmem [resolvable:$true] %s1439_s7 }
 0x5a9   :  { %s1874_s8 = scalar_lea.vmem %s1440_s7, 256  ;;  %p1879_p11 = scmp.lt.s32.totalorder %s1440_s7, %s1440_s7 }
 0x5aa   :  { %p1875_p10 = scmp.ne.s32.totalorder %s1440_s7, %s1874_s8  ;;  %p1880_p12 = scmp.lt.s32.totalorder %s1874_s8, %s1874_s8 }
 0x5ab   :  { %1660 = vmatpush3.bf16.msra.mxu1 %v1767_v20 }
 0x5ac   :  { %p1881_p13 = por %p1880_p12, %p1879_p11 }
 0x5ae   :  { %p1882_p0 = pnand %p1881_p13, %p1875_p10 }
 0x671   :  { %v1197_v42 = vpop.f32.mrb[32].mxu1 }
 0x672   :  { %v1198_v43 = vadd.f32 %v1471_v41, %v1197_v42  ;;  %v1643_v44 = vpop.f32.mrb[33].mxu1 }
 0x673   :  { %v1200_v45 = vpop.f32.mrb[34].mxu1 }
 0x674   :  { %v1201_v46 = vadd.f32 %v1471_v41, %v1200_v45  ;;  %v1644_v47 = vpop.f32.mrb[35].mxu1  ;;  %v1206_v48 = vadd.f32 %v1198_v43, %v2035_v3 }
 0x676   :  { %v1208_v49 = vsel %vm94_vm1, %v1206_v48, 0.0  ;;  %v1207_v50 = vadd.f32 %v1201_v46, %v2040_v4  ;;  %v1763_v4 = vld [vmem:[#allocation7 + $0x8] sm:$0xff]  }
 0x677   :  { %1209 = vadd.xlane.f32.xlu0 %v1208_v49  ;;  %1648 = vmatpush3.bf16.msra.mxu0 %v1763_v4 }
 0x678   :  { %v1211_v51 = vsel %vm94_vm1, %v1207_v50, 0.0 }
 0x679   :  { %1212 = vadd.xlane.f32.xlu1 %v1211_v51 }
 0x704   :  { %v1210_v52 = vpop.xlane.xlu0 %1209 }
 0x705   :  { %v1215_v53 = vmul.f32 0.03125, %v1210_v52 }
 0x706   :  { %v1213_v54 = vpop.xlane.xlu1 %1212 }
 0x707   :  { %v1217_v55 = vsub.f32 %v1206_v48, %v1215_v53  ;;  %v1216_v56 = vmul.f32 0.03125, %v1213_v54 }
 0x709   :  { %v1218_v57 = vsub.f32 %v1207_v50, %v1216_v56  ;;  %v1219_v58 = vmul.f32 %v1217_v55, %v1217_v55  ;;  %v1233_v10 = vmul.f32 %v2228_v8, %v1217_v55 }
 0x70b   :  { %v1221_v59 = vsel %vm94_vm1, %v1219_v58, 0.0  ;;  %v1220_v60 = vmul.f32 %v1218_v57, %v1218_v57  ;;  %v1234_v11 = vmul.f32 %v2228_v8, %v1218_v57 }
 0x70c   :  { %1222 = vadd.xlane.f32.xlu0 %v1221_v59 }
 0x70d   :  { %v1224_v3 = vsel %vm94_vm1, %v1220_v60, 0.0 }
 0x710   :  { %1225 = vadd.xlane.f32.xlu0 %v1224_v3 }
 0x799   :  { %v1223_v1 = vpop.xlane.xlu0 %1222 }
 0x79a   :  { %v1227_v2 = vmul.f32 0.03125, %v1223_v1 }
 0x79c   :  { %v1235_v34 = vadd.f32 1e-06, %v1227_v2 }
 0x79d   :  { %v1226_v5 = vpop.xlane.xlu0 %1225 }
 0x79e   :  { %1800 = vrsqrt.f32 %v1235_v34  ;;  %v1228_v6 = vmul.f32 0.03125, %v1226_v5 }
 0x7a0   :  { %v1236_v7 = vadd.f32 1e-06, %v1228_v6 }
 0x7a2   :  { %1802 = vrsqrt.f32 %v1236_v7 }
 0x7a8   :  { %v1801_v9 = vpop.eup %1800 }
 0x7a9   :  { %v1239_v12 = vmul.f32 %v1801_v9, %v1233_v10 }
 0x7ab   :  { %v1245_v16 = vadd.f32 %v2235_v14, %v1239_v12 }
 0x7ac   :  { %v1803_v13 = vpop.eup %1802 }
 0x7ad   :  { %v1240_v15 = vmul.f32 %v1803_v13, %v1234_v11 }
 0x7af   :  { %v1246_v17 = vadd.f32 %v2235_v14, %v1240_v15 }
 0x7b1   :  { %v1247_v18 = vpack.c.bf16 %v1246_v17, %v1245_v16 }
 0x7b3   :  { %1650 = vmatmul.mubr.msk.bf16.vlgmr.msra.gmra.mrb[36].mxu0 %vm94_vm1, %v1247_v18 }
 0x886   :  { %v1308_v23 = vpop.f32.mrb[36].mxu0 }
 0x887   :  { %v1309_v24 = vadd.f32 %v1477_v21, %v1308_v23  ;;  %v1651_v22 = vpop.f32.mrb[37].mxu0 }
 0x888   :  { %v1311_v25 = vpop.f32.mrb[38].mxu0 }
 0x889   :  { %v1312_v26 = vadd.f32 %v1477_v21, %v1311_v25  ;;  %v1652_v27 = vpop.f32.mrb[39].mxu0  ;;  %v1315_v28 = vmax.f32 %v1309_v24, 0.0 }
 0x88b   :  { %v1316_v29 = vmax.f32 %v1312_v26, 0.0 }
 0x88d   :  { %v1317_v30 = vpack.c.bf16 %v1316_v29, %v1315_v28 }
 0x88f   :  { %1662 = vmatmul.mubr.msk.bf16.vlgmr.msra.gmra.mrb[36].mxu1 %vm1355_vm6, %v1317_v30 }
 0x962   :  { %v1393_v31 = vpop.f32.mrb[36].mxu1 }
 0x963   :  { %v1394_v32 = vadd.f32 %v1481_v0, %v1393_v31  ;;  %v1663_v33 = vpop.f32.mrb[37].mxu1 }
 0x964   :  { %v1396_v35 = vpop.f32.mrb[38].mxu1 }
 0x965   :  { %v1397_v36 = vadd.f32 %v1481_v0, %v1396_v35  ;;  %v1664_v37 = vpop.f32.mrb[39].mxu1  ;;  %v1400_v38 = vadd.f32 %v1394_v32, %v1245_v16 }
 0x967   :  { %v1402_v39 = vsel %vm94_vm1, %v1400_v38, 0.0  ;;  %v1401_v40 = vadd.f32 %v1397_v36, %v1246_v17 }
 0x968   :  { %1403 = vadd.xlane.f32.xlu1 %v1402_v39 }
 0x969   :  { %v1405_v41 = vsel %vm94_vm1, %v1401_v40, 0.0 }
 0x96a   :  { %1406 = vadd.xlane.f32.xlu0 %v1405_v41 }
 0x9f5   :  { %v1404_v42 = vpop.xlane.xlu1 %1403 }
 0x9f6   :  { %v1408_v43 = vmul.f32 0.03125, %v1404_v42 }
 0x9f7   :  { %v1407_v44 = vpop.xlane.xlu0 %1406 }
 0x9f8   :  { %v1410_v45 = vsub.f32 %v1400_v38, %v1408_v43  ;;  %v1409_v46 = vmul.f32 0.03125, %v1407_v44 }
 0x9fa   :  { %v1411_v47 = vsub.f32 %v1401_v40, %v1409_v46  ;;  %v1412_v48 = vmul.f32 %v1410_v45, %v1410_v45  ;;  %v1422_v58 = vmul.f32 %v2228_v8, %v1410_v45 }
 0x9fc   :  { %v1414_v49 = vsel %vm94_vm1, %v1412_v48, 0.0  ;;  %v1413_v50 = vmul.f32 %v1411_v47, %v1411_v47  ;;  %v1423_v60 = vmul.f32 %v2228_v8, %v1411_v47 }
 0x9fd   :  { %1415 = vadd.xlane.f32.xlu1 %v1414_v49 }
 0x9fe   :  { %v1417_v51 = vsel %vm94_vm1, %v1413_v50, 0.0 }
 0x9ff   :  { %1418 = vadd.xlane.f32.xlu0 %v1417_v51 }
 0xa8a   :  { %v1416_v52 = vpop.xlane.xlu1 %1415 }
 0xa8b   :  { %v1420_v53 = vmul.f32 0.03125, %v1416_v52 }
 0xa8c   :  { %v1419_v54 = vpop.xlane.xlu0 %1418 }
 0xa8d   :  { %v1424_v55 = vadd.f32 1e-06, %v1420_v53  ;;  %v1421_v56 = vmul.f32 0.03125, %v1419_v54 }
 0xa8f   :  { %1804 = vrsqrt.f32 %v1424_v55  ;;  %v1425_v57 = vadd.f32 1e-06, %v1421_v56 }
 0xa91   :  { %1806 = vrsqrt.f32 %v1425_v57 }
 0xa99   :  { %v1805_v59 = vpop.eup %1804 }
 0xa9a   :  { %v1428_v3 = vmul.f32 %v1805_v59, %v1422_v58 }
 0xa9b   :  { %v1807_v61 = vpop.eup %1806 }
 0xa9c   :  { %v1429_v4 = vmul.f32 %v1807_v61, %v1423_v60  ;;  %v1430_v62 = vadd.f32 %v2235_v14, %v1428_v3 }
 0xa9e   :  { %v1431_v63 = vadd.f32 %v2235_v14, %v1429_v4  ;;  %1432 = vst.msk [vmem:[#allocation8] sm:$0xff] %vm94_vm1, %v1430_v62 }
 0xaa0   :  { %1433 = vst.msk [vmem:[#allocation8 + $0x8] sm:$0xff] %vm94_vm1, %v1431_v63 }
 0xaa1   :  { %1885 = shalt.err (!%p1882_p0)
}
 0xaa2   :  { %s1886_s1 = scalar_lea.hbm %s2287_s9, 256 }
 0xaa3   :  { %p1887_p1 = scmp.ne.s32.totalorder %s2287_s9, %s1886_s1  ;;  %p1890_p2 = scmp.lt.u32.totalorder %s1886_s1, %s2287_s9 }
 0xaa5   :  { %p1892_p3 = pnand %p1890_p2, %p1887_p1 }
 0xaa7   :  { %1895 = shalt.err (!%p1892_p3)
}
 0xaa8   :  { %1445 = dma.vmem_to_hbm [thread:$0]  %s1440_s7, 256, %s2287_s9, [#allocation4], %s1906_s4, %s1906_s4, %s1907_s10  }
 0xaa9   :  { %1900 = dma.done.wait [#allocation4], 256  }
 0xaaa   :  { %1901 = vsyncadd [#allocation4], 4294967040 }
 0xaab   :  { %1449 = vsyncpa [#allocation3], 1 }
 0xaac   :  { %1450 = vsyncpa [#allocation6], 1 }
 0xaad   :  { %1451 = vsyncpa [#allocation4], 1 }

</bundles_post_ra>
